<compile_context>
chip_gen: v7x
topology: tpu7x:2x2x1
jax: 0.10.0
libtpu: 0.0.40
codegen_flags: <defaults>
</compile_context>

<pallas_src>
import functools

import jax
import jax.numpy as jnp
from jax.experimental import pallas as pl
from jax.experimental.pallas import tpu as pltpu


LANE = 128  # feature-dim padding granularity (lane width)


def _round_up(x, m):
    return ((x + m - 1) // m) * m


def _pad2d(a, rows, cols):
    return jnp.pad(a, ((0, rows - a.shape[0]), (0, cols - a.shape[1])))


def _pick_block(num_nodes):
    """Square tile for the (row, neighbor) grid; grows with graph size."""
    npad = _round_up(num_nodes, LANE)
    if npad >= 4096:   # >= 8 row tiles -> good 2-TC balance on v7x
        return 512
    if npad >= 1024:
        return 256
    return 128


# ---------------------------------------------------------------------------
# Fused SAGEConv kernel (one layer):
#   acc[i-tile]  += A_count[i-tile, k-tile] (int8 -> bf16) @ X[k-tile]
#   at k == last:
#     g = acc * deg_inv[i-tile]                       (exact f32 mean)
#     o = (g @ Wl + X[i-tile] @ Wr + b) * row_valid   -> bf16
# ---------------------------------------------------------------------------
def sage_fused_kernel(a_ref, xk_ref, xi_ref, wl_ref, wr_ref, b_ref,
                      dinv_ref, valid_ref, o_ref, acc_ref):
    k = pl.program_id(1)

    @pl.when(k == 0)
    def _():
        acc_ref[...] = jnp.zeros_like(acc_ref)

    # int8 -> bf16 upcast is VPU work hidden under the A-tile DMA.
    acc_ref[...] += jnp.dot(
        a_ref[...].astype(jnp.bfloat16), xk_ref[...],
        preferred_element_type=jnp.float32,
    )

    @pl.when(k == pl.num_programs(1) - 1)
    def _():
        g = (acc_ref[...] * dinv_ref[...]).astype(jnp.bfloat16)
        h = jnp.dot(g, wl_ref[...], preferred_element_type=jnp.float32)
        h = h + jnp.dot(xi_ref[...], wr_ref[...],
                        preferred_element_type=jnp.float32)
        h = h + b_ref[...]
        # Row-valid mask zeroes padded rows (otherwise they would equal b).
        o_ref[...] = (h * valid_ref[...]).astype(o_ref.dtype)


def sage_conv_pallas(a_cnt, x_pad, w_l, w_r, b_pad, dinv, valid, *, block):
    """One fused SAGEConv layer on the padded domain.

    a_cnt : (Np, Np)       int8  edge counts (exact), zero-padded
    x_pad : (Np, Cin_p)    bf16  node features, zero-padded
    w_l   : (Cin_p, Cout_p) bf16 neighbor weight, zero-padded
    w_r   : (Cin_p, Cout_p) bf16 root weight, zero-padded
    b_pad : (1, Cout_p)    f32   bias, zero-padded
    dinv  : (Np, 1)        f32   1/in-degree (0 for isolated / padded rows)
    valid : (Np, 1)        f32   1.0 for real rows, 0.0 for padded rows
    returns h_pad : (Np, Cout_p) bf16 with padded rows/cols exactly zero
    """
    np_, cin_p = x_pad.shape
    cout_p = w_l.shape[1]
    n_row_tiles = np_ // block
    n_k_tiles = np_ // block

    # TODO(synk): when Cin_p >> Cout_p, split the aggregation over feature
    # chunks (or fall back to the un-fused two-kernel form) to bound the
    # (block, Cin_p) f32 accumulator; for this model both pad to 128.
    flops = 2 * np_ * np_ * cin_p + 2 * 2 * np_ * cin_p * cout_p
    bytes_accessed = (
        np_ * np_ * 1                      # int8 adjacency (dominant stream)
        + n_row_tiles * np_ * cin_p * 2    # X streamed once per row tile
        + np_ * cin_p * 2                  # X root tiles
        + 2 * cin_p * cout_p * 2           # resident weights
        + np_ * cout_p * 2                 # bf16 output writeback
        + np_ * 4 * 2                      # deg_inv + valid
    )

    return pl.pallas_call(
        sage_fused_kernel,
        out_shape=jax.ShapeDtypeStruct((np_, cout_p), jnp.bfloat16),
        grid_spec=pltpu.PrefetchScalarGridSpec(
            num_scalar_prefetch=0,
            grid=(n_row_tiles, n_k_tiles),
            in_specs=[
                pl.BlockSpec((block, block), lambda i, k: (i, k)),    # A counts
                pl.BlockSpec((block, cin_p), lambda i, k: (k, 0)),    # X neighbor
                pl.BlockSpec((block, cin_p), lambda i, k: (i, 0)),    # X root
                pl.BlockSpec((cin_p, cout_p), lambda i, k: (0, 0)),   # Wl resident
                pl.BlockSpec((cin_p, cout_p), lambda i, k: (0, 0)),   # Wr resident
                pl.BlockSpec((1, cout_p), lambda i, k: (0, 0)),       # bias
                pl.BlockSpec((block, 1), lambda i, k: (i, 0)),        # 1/deg
                pl.BlockSpec((block, 1), lambda i, k: (i, 0)),        # row valid
            ],
            out_specs=pl.BlockSpec((block, cout_p), lambda i, k: (i, 0)),
            scratch_shapes=[pltpu.VMEM((block, cin_p), jnp.float32)],
        ),
        compiler_params=pltpu.CompilerParams(
            dimension_semantics=("parallel", "arbitrary"),
            vmem_limit_bytes=32 * 1024 * 1024,
        ),
        cost_estimate=pl.CostEstimate(
            flops=flops, transcendentals=0, bytes_accessed=bytes_accessed
        ),
    )(a_cnt, x_pad, x_pad, w_l, w_r, b_pad, dinv, valid)


def build_adjacency(edge_index, num_nodes):
    """Dense edge-count matrix (int8, exact) + f32 per-row 1/in-degree."""
    src, dst = edge_index[0], edge_index[1]
    counts = jnp.zeros((num_nodes, num_nodes), jnp.float32)
    counts = counts.at[dst, src].add(1.0)          # message j -> i
    deg = counts.sum(axis=1, keepdims=True)
    deg_inv = jnp.where(deg > 0, 1.0 / deg, 0.0)   # isolated nodes -> mean 0
    return counts.astype(jnp.int8), deg_inv        # assumes multiplicity < 128
# TODO(synk): for large sparse graphs, replace the dense O(N^2) adjacency with
# a CSR + PrefetchScalarGridSpec gather / segment-mean kernel (HBM O(E*C)).


def init_sage_params(key, in_channels, out_channels, n_layers):
    """Deterministic synthetic parameter init (Kaiming-uniform-like)."""
    params = []
    c_in = in_channels
    for _ in range(n_layers):
        key, k1, k2, k3 = jax.random.split(key, 4)
        scale = 1.0 / jnp.sqrt(jnp.float32(c_in))
        w_l = jax.random.uniform(k1, (c_in, out_channels), jnp.float32, -scale, scale)
        w_r = jax.random.uniform(k2, (c_in, out_channels), jnp.float32, -scale, scale)
        b = jax.random.uniform(k3, (out_channels,), jnp.float32, -scale, scale)
        params.append((w_l, w_r, b))
        c_in = out_channels
    return params


@functools.partial(jax.jit, static_argnames=("num_nodes", "cat"))
def sage_gnn_forward(x, edge_index, params, *, num_nodes, cat=True):
    _, cin = x.shape
    block = _pick_block(num_nodes)
    np_ = _round_up(num_nodes, block)   # block_m == block_k, so this divides both

    a_cnt, deg_inv = build_adjacency(edge_index, num_nodes)
    a_pad = _pad2d(a_cnt, np_, np_)                                   # int8
    dinv_pad = jnp.pad(deg_inv, ((0, np_ - num_nodes), (0, 0)))       # (Np,1) f32
    valid = (jnp.arange(np_) < num_nodes).astype(jnp.float32).reshape(np_, 1)

    xs = [x]
    h_pad = _pad2d(x, np_, _round_up(cin, LANE)).astype(jnp.bfloat16)
    for (w_l, w_r, b) in params:
        c_in, c_out = w_l.shape
        cin_p = _round_up(c_in, LANE)
        cout_p = _round_up(c_out, LANE)
        wl_pad = _pad2d(w_l, cin_p, cout_p).astype(jnp.bfloat16)
        wr_pad = _pad2d(w_r, cin_p, cout_p).astype(jnp.bfloat16)
        b_pad = jnp.pad(b, (0, cout_p - c_out)).reshape(1, cout_p)

        # (Np, Cout_p) bf16, padded rows/cols exactly zero -> feeds next layer.
        h_pad = sage_conv_pallas(a_pad, h_pad, wl_pad, wr_pad, b_pad,
                                 dinv_pad, valid, block=block)
        xs.append(h_pad[:num_nodes, :c_out].astype(jnp.float32))

    return jnp.concatenate(xs, axis=-1) if cat else xs[-1]


def sage_gnn_reference(x, edge_index, params, num_nodes, cat=True):
    """Plain-JAX f32 reference (highest matmul precision)."""
    counts, deg_inv = build_adjacency(edge_index, num_nodes)
    a = counts.astype(jnp.float32) * deg_inv
    hp = jax.lax.Precision.HIGHEST
    xs = [x]
    for (w_l, w_r, b) in params:
        agg = jnp.dot(a, xs[-1], precision=hp)
        xs.append(
            jnp.dot(agg, w_l, precision=hp) + jnp.dot(xs[-1], w_r, precision=hp) + b
        )
    return jnp.concatenate(xs, axis=-1) if cat else xs[-1]


if __name__ == "__main__":
    key = jax.random.PRNGKey(0)

    # Small graph: 256 nodes -> block 128 -> a 2x2 tile grid (exercises the
    # k-accumulation and the parallel row axis).
    N = 256
    in_channels = 4
    out_channels = 32
    n_layers = 3

    kx, kp = jax.random.split(key)
    x = jax.random.normal(kx, (N, in_channels), jnp.float32)

    # Deterministic bidirectional ring graph: edge_index shape (2, 2N).
    idx = jnp.arange(N, dtype=jnp.int32)
    src = jnp.concatenate([idx, (idx + 1) % N])
    dst = jnp.concatenate([(idx + 1) % N, idx])
    edge_index = jnp.stack([src, dst], axis=0)

    params = init_sage_params(kp, in_channels, out_channels, n_layers)

    out = sage_gnn_forward(x, edge_index, params, num_nodes=N, cat=True)
    out = jax.block_until_ready(out)

    expected_dim = in_channels + out_channels * n_layers   # 4 + 3*32 = 100
    assert out.shape == (N, expected_dim), out.shape
    assert bool(jnp.all(jnp.isfinite(out)))

    ref = sage_gnn_reference(x, edge_index, params, N, cat=True)
    max_err = float(jnp.max(jnp.abs(out - ref)))
    assert max_err < 0.1, f"max abs err {max_err}"   # bf16 MXU inputs, f32 accum

    print("KERNEL_OK")
</pallas_src>

<mosaic_0001>
module attributes {stable_mosaic.version = 11 : i64} {
  func.func private @main(%arg0: i32) attributes {dimension_semantics = [#tpu.dimension_semantics<core_parallel>], iteration_bounds = array<i64: 2>, tpu.core_type = #tpu.core_type<sc_scalar_subcore>, window_params = []} {
    return
  }
}

module attributes {stable_mosaic.version = 11 : i64} {
  func.func private @main(%arg0: i32) attributes {dimension_semantics = [#tpu.dimension_semantics<core_parallel>], iteration_bounds = array<i64: 2>, tpu.core_type = #tpu.core_type<sc_scalar_subcore>, window_params = []} {
    return
  }
}

module attributes {stable_mosaic.version = 11 : i64} {
  func.func @sage_fused_kernel(%arg0: i32, %arg1: i32, %arg2: memref<128x128xi8, #tpu.memory_space<vmem>>, %arg3: memref<128x128xbf16, #tpu.memory_space<vmem>>, %arg4: memref<128x128xbf16, #tpu.memory_space<vmem>>, %arg5: memref<128x128xbf16, #tpu.memory_space<vmem>>, %arg6: memref<128x128xbf16, #tpu.memory_space<vmem>>, %arg7: memref<1x128xf32, #tpu.memory_space<vmem>>, %arg8: memref<128x1xf32, #tpu.memory_space<vmem>>, %arg9: memref<128x1xf32, #tpu.memory_space<vmem>>, %arg10: memref<128x128xbf16, #tpu.memory_space<vmem>>, %arg11: memref<128x128xf32, #tpu.memory_space<vmem>>) attributes {dimension_semantics = [#tpu.dimension_semantics<parallel>, #tpu.dimension_semantics<arbitrary>], iteration_bounds = array<i64: 2, 2>, scalar_prefetch = 0 : i64, scratch_operands = 1 : i64, tpu.core_type = #tpu.core_type<tc>, window_params = [{transform_indices = @transform_0, window_bounds = array<i64: 128, 128>}, {transform_indices = @transform_1, window_bounds = array<i64: 128, 128>}, {transform_indices = @transform_2, window_bounds = array<i64: 128, 128>}, {pipeline_mode = #tpu.pipeline_mode<synchronous>, transform_indices = @transform_3, window_bounds = array<i64: 128, 128>}, {pipeline_mode = #tpu.pipeline_mode<synchronous>, transform_indices = @transform_4, window_bounds = array<i64: 128, 128>}, {pipeline_mode = #tpu.pipeline_mode<synchronous>, transform_indices = @transform_5, window_bounds = array<i64: 1, 128>}, {transform_indices = @transform_6, window_bounds = array<i64: 128, 1>}, {transform_indices = @transform_7, window_bounds = array<i64: 128, 1>}, {transform_indices = @transform_8, window_bounds = array<i64: 128, 128>}]} {
    %c0_i32 = arith.constant 0 : i32
    %0 = arith.cmpi eq, %arg1, %c0_i32 : i32
    %1 = arith.extui %0 : i1 to i32
    %c0_i32_0 = arith.constant 0 : i32
    %2 = arith.cmpi ne, %1, %c0_i32_0 : i32
    scf.if %2 {
      %cst_9 = arith.constant 0.000000e+00 : f32
      %13 = vector.broadcast %cst_9 : f32 to vector<128x128xf32>
      %c0_10 = arith.constant 0 : index
      %c0_11 = arith.constant 0 : index
      %14 = vector.load %arg11[%c0_10, %c0_11] : memref<128x128xf32, #tpu.memory_space<vmem>>, vector<128x128xf32>
      tpu.vector_store %arg11[%c0_10, %c0_11], %13 {strides = array<i32>} : memref<128x128xf32, #tpu.memory_space<vmem>>, vector<128x128xf32>,
    } else {
    }
    %c0 = arith.constant 0 : index
    %c0_1 = arith.constant 0 : index
    %3 = vector.load %arg11[%c0, %c0_1] : memref<128x128xf32, #tpu.memory_space<vmem>>, vector<128x128xf32>
    %c0_2 = arith.constant 0 : index
    %c0_3 = arith.constant 0 : index
    %4 = vector.load %arg2[%c0_2, %c0_3] : memref<128x128xi8, #tpu.memory_space<vmem>>, vector<128x128xi8>
    %5 = arith.sitofp %4 : vector<128x128xi8> to vector<128x128xbf16>
    %c0_4 = arith.constant 0 : index
    %c0_5 = arith.constant 0 : index
    %6 = vector.load %arg3[%c0_4, %c0_5] : memref<128x128xbf16, #tpu.memory_space<vmem>>, vector<128x128xbf16>
    %cst = arith.constant dense<0.000000e+00> : vector<128x128xf32>
    %7 = tpu.matmul %5, %6, %cst {dimension_numbers = #tpu.dot_dimension_numbers<[1], [0], [0], [1], [0, 0, 1, 1], [], []>} : vector<128x128xbf16>, vector<128x128xbf16>, vector<128x128xf32> -> vector<128x128xf32>
    %8 = arith.addf %3, %7 : vector<128x128xf32>
    %c0_6 = arith.constant 0 : index
    %c0_7 = arith.constant 0 : index
    %9 = vector.load %arg11[%c0_6, %c0_7] : memref<128x128xf32, #tpu.memory_space<vmem>>, vector<128x128xf32>
    tpu.vector_store %arg11[%c0_6, %c0_7], %8 {strides = array<i32>} : memref<128x128xf32, #tpu.memory_space<vmem>>, vector<128x128xf32>,
    %c1_i32 = arith.constant 1 : i32
    %10 = arith.cmpi eq, %arg1, %c1_i32 : i32
    %11 = arith.extui %10 : i1 to i32
    %c0_i32_8 = arith.constant 0 : i32
    %12 = arith.cmpi ne, %11, %c0_i32_8 : i32
    scf.if %12 {
      %c0_9 = arith.constant 0 : index
      %c0_10 = arith.constant 0 : index
      %13 = vector.load %arg11[%c0_9, %c0_10] : memref<128x128xf32, #tpu.memory_space<vmem>>, vector<128x128xf32>
      %c0_11 = arith.constant 0 : index
      %c0_12 = arith.constant 0 : index
      %14 = vector.load %arg8[%c0_11, %c0_12] : memref<128x1xf32, #tpu.memory_space<vmem>>, vector<128x1xf32>
      %15 = vector.broadcast %14 : vector<128x1xf32> to vector<128x128xf32>
      %16 = arith.mulf %13, %15 : vector<128x128xf32>
      %17 = arith.truncf %16 : vector<128x128xf32> to vector<128x128xbf16>
      %c0_13 = arith.constant 0 : index
      %c0_14 = arith.constant 0 : index
      %18 = vector.load %arg5[%c0_13, %c0_14] : memref<128x128xbf16, #tpu.memory_space<vmem>>, vector<128x128xbf16>
      %cst_15 = arith.constant dense<0.000000e+00> : vector<128x128xf32>
      %19 = tpu.matmul %17, %18, %cst_15 {dimension_numbers = #tpu.dot_dimension_numbers<[1], [0], [0], [1], [0, 0, 1, 1], [], []>} : vector<128x128xbf16>, vector<128x128xbf16>, vector<128x128xf32> -> vector<128x128xf32>
      %c0_16 = arith.constant 0 : index
      %c0_17 = arith.constant 0 : index
      %20 = vector.load %arg4[%c0_16, %c0_17] : memref<128x128xbf16, #tpu.memory_space<vmem>>, vector<128x128xbf16>
      %c0_18 = arith.constant 0 : index
      %c0_19 = arith.constant 0 : index
      %21 = vector.load %arg6[%c0_18, %c0_19] : memref<128x128xbf16, #tpu.memory_space<vmem>>, vector<128x128xbf16>
      %cst_20 = arith.constant dense<0.000000e+00> : vector<128x128xf32>
      %22 = tpu.matmul %20, %21, %cst_20 {dimension_numbers = #tpu.dot_dimension_numbers<[1], [0], [0], [1], [0, 0, 1, 1], [], []>} : vector<128x128xbf16>, vector<128x128xbf16>, vector<128x128xf32> -> vector<128x128xf32>
      %23 = arith.addf %19, %22 : vector<128x128xf32>
      %c0_21 = arith.constant 0 : index
      %c0_22 = arith.constant 0 : index
      %24 = vector.load %arg7[%c0_21, %c0_22] : memref<1x128xf32, #tpu.memory_space<vmem>>, vector<1x128xf32>
      %25 = vector.broadcast %24 : vector<1x128xf32> to vector<128x128xf32>
      %26 = arith.addf %23, %25 : vector<128x128xf32>
      %c0_23 = arith.constant 0 : index
      %c0_24 = arith.constant 0 : index
      %27 = vector.load %arg9[%c0_23, %c0_24] : memref<128x1xf32, #tpu.memory_space<vmem>>, vector<128x1xf32>
      %28 = vector.broadcast %27 : vector<128x1xf32> to vector<128x128xf32>
      %29 = arith.mulf %26, %28 : vector<128x128xf32>
      %30 = arith.truncf %29 : vector<128x128xf32> to vector<128x128xbf16>
      %c0_25 = arith.constant 0 : index
      %c0_26 = arith.constant 0 : index
      %31 = vector.load %arg10[%c0_25, %c0_26] : memref<128x128xbf16, #tpu.memory_space<vmem>>, vector<128x128xbf16>
      tpu.vector_store %arg10[%c0_25, %c0_26], %30 {strides = array<i32>} : memref<128x128xbf16, #tpu.memory_space<vmem>>, vector<128x128xbf16>,
    } else {
    }
    return
  }
  func.func @transform_0(%arg0: i32, %arg1: i32) -> (i32, i32) {
    %c0_i32 = arith.constant 0 : i32
    return %arg0, %arg1 : i32, i32
  }
  func.func @transform_1(%arg0: i32, %arg1: i32) -> (i32, i32) {
    %c0_i32 = arith.constant 0 : i32
    %c0_i32_0 = arith.constant 0 : i32
    return %arg1, %c0_i32 : i32, i32
  }
  func.func @transform_2(%arg0: i32, %arg1: i32) -> (i32, i32) {
    %c0_i32 = arith.constant 0 : i32
    %c0_i32_0 = arith.constant 0 : i32
    return %arg0, %c0_i32 : i32, i32
  }
  func.func @transform_3(%arg0: i32, %arg1: i32) -> (i32, i32) {
    %c0_i32 = arith.constant 0 : i32
    %c0_i32_0 = arith.constant 0 : i32
    %c0_i32_1 = arith.constant 0 : i32
    return %c0_i32, %c0_i32_0 : i32, i32
  }
  func.func @transform_4(%arg0: i32, %arg1: i32) -> (i32, i32) {
    %c0_i32 = arith.constant 0 : i32
    %c0_i32_0 = arith.constant 0 : i32
    %c0_i32_1 = arith.constant 0 : i32
    return %c0_i32, %c0_i32_0 : i32, i32
  }
  func.func @transform_5(%arg0: i32, %arg1: i32) -> (i32, i32) {
    %c0_i32 = arith.constant 0 : i32
    %c0_i32_0 = arith.constant 0 : i32
    %c0_i32_1 = arith.constant 0 : i32
    return %c0_i32, %c0_i32_0 : i32, i32
  }
  func.func @transform_6(%arg0: i32, %arg1: i32) -> (i32, i32) {
    %c0_i32 = arith.constant 0 : i32
    %c0_i32_0 = arith.constant 0 : i32
    return %arg0, %c0_i32 : i32, i32
  }
  func.func @transform_7(%arg0: i32, %arg1: i32) -> (i32, i32) {
    %c0_i32 = arith.constant 0 : i32
    %c0_i32_0 = arith.constant 0 : i32
    return %arg0, %c0_i32 : i32, i32
  }
  func.func @transform_8(%arg0: i32, %arg1: i32) -> (i32, i32) {
    %c0_i32 = arith.constant 0 : i32
    %c0_i32_0 = arith.constant 0 : i32
    return %arg0, %c0_i32 : i32, i32
  }
}

</mosaic_0001>

<bundles_post_ra>
// kernel: sage_gnn_forward.3
= control target key start
LH: loop header
LB: loop body
LE: loop exit
PB: predicated region body
PF: predicated region fallthrough
CT: control target
= control target key end

     0   :  { %s2336_s0 = inlined_call_operand.vmem [shape: s8[256,256], index: 0, kind: input, shape index: {}]   ;;  %s2337_s1 = inlined_call_operand.vmem [shape: bf16[256,128], index: 1, kind: input, shape index: {}, may-alias: {1,2}]   ;;  %s2338_s2 = inlined_call_operand.vmem [shape: bf16[256,128], index: 2, kind: input, shape index: {}, may-alias: {1,2}]   ;;  %s2339_s3 = inlined_call_operand.vmem [shape: bf16[128,128], index: 3, kind: input, shape index: {}]   ;;  %s2340_s4 = inlined_call_operand.vmem [shape: bf16[128,128], index: 4, kind: input, shape index: {}]   ;;  %s2341_s5 = inlined_call_operand.vmem [shape: f32[1,128], index: 5, kind: input, shape index: {}]   ;;  %s2342_s6 = inlined_call_operand.vmem [shape: f32[256,1], index: 6, kind: input, shape index: {}]   ;;  %s2343_s7 = inlined_call_operand.vmem [shape: f32[256,1], index: 7, kind: input, shape index: {}]   ;;  %s2344_s8 = inlined_call_operand.vmem [shape: bf16[256,128], index: 8, kind: output, shape index: {}]  }
   0x1   :  { %2347 = sst [smem:[#allocation6_spill]] %s2336_s0 }
   0x2   :  { %s2074_s27 = smov 0   ;;  %s2076_s28 = smov 0  }
   0x3   :  { %s2078_s29 = smov 0   ;;  %s2080_s30 = smov 0  }
   0x4   :  { %s2082_s9 = smov 0   ;;  %s2084_s10 = smov 0  }
   0x5   :  { %s2086_s11 = smov 0  }
   0x6 LB: > { %s27_s12 = sadd.s32 1, %s2017_s9  ;;  %s30_s13 = sadd.s32 1, %s2021_s10  ;;  %s2025_s11 = sphi %s2086_s11, %s18_s11   ;;  %s2021_s10 = sphi %s2084_s10, %s2358_s10   ;;  %s2017_s9 = sphi %s2082_s9, %s2357_s9   ;;  %s2013_s30 = sphi %s2080_s30, %s2356_s30   ;;  %s2009_s29 = sphi %s2078_s29, %s2355_s29   ;;  %s2005_s28 = sphi %s2076_s28, %s2354_s28   ;;  %s2001_s27 = sphi %s2074_s27, %s2353_s27  }
   0x7   : > { %p28_p0 = scmp.ge.s32.totalorder %s27_s12, 2  ;;  %p46_p1 = scmp.ne.s32.totalorder %s2005_s28, %s2001_s27 }
   0x8   : > { %p47_p2 = scmp.eq.s32.totalorder %s2025_s11, 0  ;;  %s39_s17 = sadd.s32 1, %s2005_s28 }
   0x9   : > { %s2360_s12 = smov (%p28_p0, %s27_s12), 0  ;;  %s2362_s13 = smov (!%p28_p0, %s30_s13), %s2021_s10 }
   0xa   : > { %2348 = sst [smem:[#allocation4_spill]] %s2360_s12  ;;  %p48_p3 = por %p47_p2, %p46_p1 }
   0xb   : > { %p32_p4 = scmp.ge.s32.totalorder %s2362_s13, 2  ;;  %s35_s14 = ssub.s32 %s2017_s9, %s2360_s12 }
   0xc   : > { %p1569_p6 = scmp.ge.s32.totalorder %s2025_s11, 4 }
   0xd   : > { %s2364_s13 = smov (%p32_p4, %s2362_s13), 0 }
   0xe   : > { %2349 = sst [smem:[#allocation5_spill]] %s2364_s13  ;;  %s34_s15 = ssub.s32 %s2021_s10, %s2364_s13 }
   0xf   : > { %s36_s16 = sor.u32 %s35_s14, %s34_s15  ;;  %274 = sbr.rel (%p1569_p6) target bundleno = 34 (0x22), region = 28 }
  0x10   : > { %p37_p5 = scmp.eq.s32.totalorder %s36_s16, 0 }
  0x12   : > { %s2125_s18 = scalar_select %p37_p5, %s2005_s28, %s39_s17  }
  0x16   : > { %277 = sbr.rel (!%p48_p3) target bundleno = 34 (0x22), region = 32  ;;  %s279_s19 = sand.u32 (%p48_p3), 1, %s2005_s28  }
  0x17   : > { %s1639_s20 = sshll.u32 (%p48_p3), %s2021_s10, 3  ;;  %s1570_s21 = sshll.u32 (%p48_p3), %s279_s19, 5 }
  0x18   : > { %s284_s22 = sadd.s32 (%p48_p3), %s2017_s9, %s1639_s20  ;;  %s2350_s0 = sld [smem:[#allocation6_spill]] (%p48_p3) }
  0x19   : > { %s1573_s23 = sshll.u32 (%p48_p3), %s284_s22, 3  ;;  %s281_s14 = scalar_lea.vmem (%p48_p3), [#allocation3], %s1570_s21 }
  0x1e   : > { %s286_s26 = scalar_lea.vmem %s2350_s0, %s1573_s23 }
  0x1f   : > { %v320_v0 = vld [vmem:[%s286_s26] sm:$0xff]  ;;  %v322_v1 = vld [vmem:[%s286_s26 + $0x10] sm:$0xff] }
  0x20   : > { %v324_v2 = vld [vmem:[%s286_s26 + $0x20] sm:$0xff]  ;;  %321 = vst [vmem:[%s281_s14] sm:$0xff] %v320_v0  ;;  %323 = vst [vmem:[%s281_s14 + $0x8] sm:$0xff] %v322_v1  ;;  %v326_v3 = vld [vmem:[%s286_s26 + $0x30] sm:$0xff] }
  0x21   : > { %325 = vst [vmem:[%s281_s14 + $0x10] sm:$0xff] %v324_v2  ;;  %327 = vst [vmem:[%s281_s14 + $0x18] sm:$0xff] %v326_v3 }
  0x22 PF: > { %p1574_p7 = scmp.ge.s32.totalorder %s2025_s11, 1  ;;  %p368_p8 = scmp.lt.s32.totalorder %s2025_s11, 5 }
  0x24   : > { %p369_p9 = pnand %p1574_p7, %p368_p8 }
  0x25   : > { %s375_s15 = sand.u32 (!%p369_p9), 1, %s2001_s27   ;;  %s1576_s16 = sshll.u32 (!%p369_p9), %s2009_s29, 4 }
  0x26   : > { %372 = sbr.rel (%p369_p9) target bundleno = 668 (0x29c), region = 86  ;;  %s1575_s17 = sshll.u32 (!%p369_p9), %s375_s15, 5 }
  0x27   : > { %p430_p10 = scmp.lt.s32.totalorder (!%p369_p9), %s1576_s16, 31  ;;  %s1578_s19 = sshll.u32 (!%p369_p9), %s2013_s30, 4 }
  0x28   : > { %p436_p11 = scmp.lt.s32.totalorder (!%p369_p9), %s1578_s19, 31  ;;  %p1586_p12 = scmp.ne.s32.totalorder (!%p369_p9), %s2009_s29, 0 }
  0x2d   : > { %s2366_s16 = smov (!%p430_p10, %s1576_s16), 31  ;;  %s2368_s19 = smov (!%p436_p11, %s1578_s19), 31 }
  0x2e   : > { %s1577_s20 = sshll.u32 %s2366_s16, 2  ;;  %s1579_s24 = sshll.u32 %s2368_s19, 2  ;;  %v2027_v4 = vmov (!%p1586_p12), 0.0  }
  0x2f   : > { %s2142_s23 = scalar_lea.vmem %s2337_s1, %s1577_s20  ;;  %s1581_s25 = sshll.u32 %s2368_s19, 3  ;;  %464 = vst [vmem:[#allocation2] sm:$0xff] (!%p1586_p12), %v2027_v4  ;;  %465 = vst [vmem:[#allocation2 + $0x8] sm:$0xff] (!%p1586_p12), %v2027_v4 }
  0x30   : > { %s2147_s0 = scalar_lea.vmem %s2338_s2, %s1579_s24  ;;  %s2152_s30 = scalar_lea.vmem %s2342_s6, %s1581_s25  ;;  %466 = vst [vmem:[#allocation2 + $0x10] sm:$0xff] (!%p1586_p12), %v2027_v4  ;;  %467 = vst [vmem:[#allocation2 + $0x18] sm:$0xff] (!%p1586_p12), %v2027_v4 }
  0x31   : > { %s2157_s12 = scalar_lea.vmem %s2343_s7, %s1581_s25  ;;  %s2162_s22 = scalar_lea.vmem %s2344_s8, %s1579_s24  ;;  %468 = vst [vmem:[#allocation2 + $0x20] sm:$0xff] (!%p1586_p12), %v2027_v4  ;;  %469 = vst [vmem:[#allocation2 + $0x28] sm:$0xff] (!%p1586_p12), %v2027_v4 }
  0x32   : > { %s2164_s19 = scalar_lea.vmem [#allocation3], %s1575_s17  ;;  %463 = sbr.rel (%p1586_p12) target bundleno = 57 (0x39), region = 94  ;;  %470 = vst [vmem:[#allocation2 + $0x30] sm:$0xff] (!%p1586_p12), %v2027_v4  ;;  %471 = vst [vmem:[#allocation2 + $0x38] sm:$0xff] (!%p1586_p12), %v2027_v4 }
  0x33   : > { %472 = vst [vmem:[#allocation2 + $0x40] sm:$0xff] (!%p1586_p12), %v2027_v4  ;;  %473 = vst [vmem:[#allocation2 + $0x48] sm:$0xff] (!%p1586_p12), %v2027_v4 }
  0x34   : > { %474 = vst [vmem:[#allocation2 + $0x50] sm:$0xff] (!%p1586_p12), %v2027_v4  ;;  %475 = vst [vmem:[#allocation2 + $0x58] sm:$0xff] (!%p1586_p12), %v2027_v4 }
  0x35   : > { %476 = vst [vmem:[#allocation2 + $0x60] sm:$0xff] (!%p1586_p12), %v2027_v4  ;;  %477 = vst [vmem:[#allocation2 + $0x68] sm:$0xff] (!%p1586_p12), %v2027_v4 }
  0x36   : > { %478 = vst [vmem:[#allocation2 + $0x70] sm:$0xff] (!%p1586_p12), %v2027_v4  ;;  %479 = vst [vmem:[#allocation2 + $0x78] sm:$0xff] (!%p1586_p12), %v2027_v4 }
  0x39 PF: > { %v1937_v5 = vld [vmem:[%s2142_s23] sm:$0xff]   ;;  %v1938_v6 = vld [vmem:[%s2142_s23 + $0x8] sm:$0xff]   ;;  %v1939_v7 = vld [vmem:[%s2142_s23 + $0x10] sm:$0xff]   ;;  %p1595_p13 = scmp.ne.s32.totalorder %s2009_s29, 1 }
  0x3a   : > { %1751 = vmatprep.subr.bf16.mxu0 %v1937_v5  ;;  %1847 = vmatprep.subr.bf16.mxu1 %v1937_v5  ;;  %v1940_v8 = vld [vmem:[%s2142_s23 + $0x18] sm:$0xff]   ;;  %v496_v9 = vld [vmem:[%s2164_s19] sm:$0xff]  ;;  %v498_v10 = vld [vmem:[%s2164_s19 + $0x10] sm:$0xff] }
  0x3b   : > { %1752 = vmatpush3.bf16.msra.mxu0 %v1937_v5  ;;  %1855 = vmatpush3.bf16.msra.mxu1 %v1937_v5  ;;  %v500_v11 = vunpack.c.l.s8.bf16 %v496_v9  ;;  %v504_v12 = vunpack.c.l.s8.bf16 %v498_v10  ;;  %v1941_v13 = vld [vmem:[%s2142_s23 + $0x20] sm:$0xff]   ;;  %v1942_v14 = vld [vmem:[%s2142_s23 + $0x28] sm:$0xff]   ;;  %v1943_v15 = vld [vmem:[%s2142_s23 + $0x30] sm:$0xff]   ;;  %v501_v19 = vunpack.c.h.s8.bf16 %v496_v9  ;;  %v505_v20 = vunpack.c.h.s8.bf16 %v498_v10 }
  0x3c   : > { %1753 = vmatprep.subr.bf16.mxu0 %v1938_v6  ;;  %1848 = vmatprep.subr.bf16.mxu1 %v1938_v6  ;;  %v1944_v16 = vld [vmem:[%s2142_s23 + $0x38] sm:$0xff]   ;;  %v497_v17 = vld [vmem:[%s2164_s19 + $0x8] sm:$0xff]  ;;  %v482_v25 = vld [vmem:[#allocation2 + $0x10] sm:$0xff] }
  0x3d   : > { %1767 = vmatprep.mubr.bf16.mxu0 %v500_v11  ;;  %1775 = vmatprep.mubr.bf16.mxu1 %v504_v12  ;;  %v499_v18 = vld [vmem:[%s2164_s19 + $0x18] sm:$0xff]  ;;  %v502_v21 = vunpack.c.l.s8.bf16 %v497_v17  ;;  %v503_v23 = vunpack.c.h.s8.bf16 %v497_v17  ;;  %v490_v26 = vld [vmem:[#allocation2 + $0x50] sm:$0xff]  ;;  %v480_v27 = vld [vmem:[#allocation2] sm:$0xff]  ;;  %v2028_v11 = vmov (!%p1595_p13), 0  }
  0x3e   : > { %v506_v22 = vunpack.c.l.s8.bf16 %v499_v18  ;;  %v507_v24 = vunpack.c.h.s8.bf16 %v499_v18  ;;  %v488_v28 = vld [vmem:[#allocation2 + $0x40] sm:$0xff]  ;;  %v483_v31 = vld [vmem:[#allocation2 + $0x18] sm:$0xff]  ;;  %v481_v37 = vld [vmem:[#allocation2 + $0x8] sm:$0xff]  ;;  %1946 = vset.pattern.permute.xlu1 (!%p1595_p13), %v2028_v11  ;;  %1945 = vset.pattern.permute.xlu0 (!%p1595_p13), %v2028_v11 }
  0x3f   : > { %1754 = vmatpush3.bf16.msra.mxu0 %v1938_v6  ;;  %1856 = vmatpush3.bf16.msra.mxu1 %v1938_v6  ;;  %v491_v32 = vld [vmem:[#allocation2 + $0x58] sm:$0xff]  ;;  %v489_v38 = vld [vmem:[#allocation2 + $0x48] sm:$0xff]  ;;  %v486_v49 = vld [vmem:[#allocation2 + $0x30] sm:$0xff] }
  0x40   : > { %1755 = vmatprep.subr.bf16.mxu0 %v1939_v7  ;;  %1849 = vmatprep.subr.bf16.mxu1 %v1939_v7  ;;  %v494_v50 = vld [vmem:[#allocation2 + $0x70] sm:$0xff]  ;;  %v484_v51 = vld [vmem:[#allocation2 + $0x20] sm:$0xff]  ;;  %v487_v55 = vld [vmem:[#allocation2 + $0x38] sm:$0xff] }
  0x41   : > { %v492_v52 = vld [vmem:[#allocation2 + $0x60] sm:$0xff]  ;;  %v495_v56 = vld [vmem:[#allocation2 + $0x78] sm:$0xff]  ;;  %v485_v61 = vld [vmem:[#allocation2 + $0x28] sm:$0xff] }
  0x42   : > { %v493_v62 = vld [vmem:[#allocation2 + $0x68] sm:$0xff]  ;;  %v723_v9 = vld [vmem:[%s2152_s30 + $0x10] sm:$0xff] (!%p1595_p13)  ;;  %v721_v10 = vld [vmem:[%s2152_s30] sm:$0xff] (!%p1595_p13) }
  0x43   : > { %1756 = vmatpush3.bf16.msra.mxu0 %v1939_v7  ;;  %1857 = vmatpush3.bf16.msra.mxu1 %v1939_v7  ;;  %v724_v12 = vld [vmem:[%s2152_s30 + $0x18] sm:$0xff] (!%p1595_p13)  ;;  %v727_v17 = vld [vmem:[%s2152_s30 + $0x30] sm:$0xff] (!%p1595_p13)  ;;  %v1947_v18 = vld [vmem:[%s2340_s4] sm:$0xff] (!%p1595_p13)  }
  0x44   : > { %1757 = vmatprep.subr.bf16.mxu0 %v1940_v8  ;;  %1850 = vmatprep.subr.bf16.mxu1 %v1940_v8 }
  0x45   : > { %749 = vperm.xlu1 (!%p1595_p13), %1946, %v723_v9   ;;  %739 = vperm.xlu0 (!%p1595_p13), %1945, %v721_v10  }
  0x47   : > { %1758 = vmatpush3.bf16.msra.mxu0 %v1940_v8  ;;  %1858 = vmatpush3.bf16.msra.mxu1 %v1940_v8 }
  0x48   : > { %1759 = vmatprep.subr.bf16.mxu0 %v1941_v13  ;;  %1851 = vmatprep.subr.bf16.mxu1 %v1941_v13 }
  0x49   : > { %754 = vperm.xlu1 (!%p1595_p13), %1946, %v724_v12  }
  0x4b   : > { %1760 = vmatpush3.bf16.msra.mxu0 %v1941_v13  ;;  %1859 = vmatpush3.bf16.msra.mxu1 %v1941_v13  ;;  %v722_v13 = vld [vmem:[%s2152_s30 + $0x8] sm:$0xff] (!%p1595_p13) }
  0x4c   : > { %1761 = vmatprep.subr.bf16.mxu0 %v1942_v14  ;;  %1852 = vmatprep.subr.bf16.mxu1 %v1942_v14 }
  0x4d   : > { %744 = vperm.xlu0 (!%p1595_p13), %1945, %v722_v13  }
  0x4f   : > { %1762 = vmatpush3.bf16.msra.mxu0 %v1942_v14  ;;  %1860 = vmatpush3.bf16.msra.mxu1 %v1942_v14  ;;  %v726_v14 = vld [vmem:[%s2152_s30 + $0x28] sm:$0xff] (!%p1595_p13) }
  0x50   : > { %1763 = vmatprep.subr.bf16.mxu0 %v1943_v15  ;;  %1853 = vmatprep.subr.bf16.mxu1 %v1943_v15 }
  0x51   : > { %764 = vperm.xlu1 (!%p1595_p13), %1946, %v726_v14  }
  0x53   : > { %1764 = vmatpush3.bf16.msra.mxu0 %v1943_v15  ;;  %1861 = vmatpush3.bf16.msra.mxu1 %v1943_v15  ;;  %v725_v15 = vld [vmem:[%s2152_s30 + $0x20] sm:$0xff] (!%p1595_p13) }
  0x54   : > { %1765 = vmatprep.subr.bf16.mxu0 %v1944_v16  ;;  %1854 = vmatprep.subr.bf16.mxu1 %v1944_v16 }
  0x55   : > { %759 = vperm.xlu0 (!%p1595_p13), %1945, %v725_v15  }
  0x57   : > { %1766 = vmatpush3.bf16.msra.mxu0 %v1944_v16  ;;  %1862 = vmatpush3.bf16.msra.mxu1 %v1944_v16  ;;  %v728_v16 = vld [vmem:[%s2152_s30 + $0x38] sm:$0xff] (!%p1595_p13) }
  0x58   : > { %1783 = vmatprep.subr.bf16.mxu1 (!%p1595_p13), %v1947_v18  ;;  %774 = vperm.xlu1 (!%p1595_p13), %1946, %v728_v16  }
  0x59   : > { %769 = vperm.xlu0 (!%p1595_p13), %1945, %v727_v17  }
  0x5a   : > { %1768 = vmatmul.mubr.bf16.vlgmr.msra.gmra.mrb[0].mxu0 %v501_v19  ;;  %1776 = vmatmul.mubr.bf16.vlgmr.msra.gmra.mrb[0].mxu1 %v505_v20  ;;  %v1948_v19 = vld [vmem:[%s2339_s3] sm:$0xff] (!%p1595_p13)   ;;  %v730_v20 = vld [vmem:[%s2152_s30 + $0x48] sm:$0xff] (!%p1595_p13) }
  0x5b   : > { %1771 = vmatprep.mubr.bf16.mxu0 %v502_v21  ;;  %1779 = vmatprep.mubr.bf16.mxu1 %v506_v22  ;;  %v1949_v21 = vld [vmem:[%s2340_s4 + $0x8] sm:$0xff] (!%p1595_p13)  }
  0x5c   : > { %v1950_v22 = vld [vmem:[%s2339_s3 + $0x8] sm:$0xff] (!%p1595_p13)   ;;  %1784 = vmatpush3.bf16.msra.mxu1 (!%p1595_p13), %v1947_v18  ;;  %1815 = vmatprep.subr.bf16.mxu0 (!%p1595_p13), %v1948_v19 }
  0x5d   : > { %1785 = vmatprep.subr.bf16.mxu1 (!%p1595_p13), %v1949_v21  ;;  %1816 = vmatpush3.bf16.msra.mxu0 (!%p1595_p13), %v1948_v19 }
  0x5e   : > { %1817 = vmatprep.subr.bf16.mxu0 (!%p1595_p13), %v1950_v22  ;;  %784 = vperm.xlu1 (!%p1595_p13), %1946, %v730_v20  }
  0x60   : > { %1786 = vmatpush3.bf16.msra.mxu1 (!%p1595_p13), %v1949_v21 }
  0x61   : > { %1818 = vmatpush3.bf16.msra.mxu0 (!%p1595_p13), %v1950_v22 }
  0x62   : > { %1772 = vmatmul.mubr.bf16.gmra.mrb[4].mxu0 %v503_v23  ;;  %1780 = vmatmul.mubr.bf16.gmra.mrb[4].mxu1 %v507_v24  ;;  %v729_v23 = vld [vmem:[%s2152_s30 + $0x40] sm:$0xff] (!%p1595_p13)  ;;  %v1951_v24 = vld [vmem:[%s2340_s4 + $0x10] sm:$0xff] (!%p1595_p13)  }
  0x63   : > { %779 = vperm.xlu0 (!%p1595_p13), %1945, %v729_v23   ;;  %1787 = vmatprep.subr.bf16.mxu1 (!%p1595_p13), %v1951_v24 }
  0x64   : > { %1788 = vmatpush3.bf16.msra.mxu1 (!%p1595_p13), %v1951_v24 }
 0x12d   : > { %v1769_v29 = vpop.f32.mrb[0].mxu0  ;;  %v1777_v30 = vpop.f32.mrb[0].mxu1 }
 0x12e   : > { %v671_v33 = vadd.f32 %v1769_v29, %v482_v25  ;;  %v679_v34 = vadd.f32 %v1777_v30, %v490_v26  ;;  %v606_v35 = vpop.f32.mrb[1].mxu0  ;;  %v638_v36 = vpop.f32.mrb[1].mxu1  ;;  %v1952_v25 = vld [vmem:[%s2339_s3 + $0x10] sm:$0xff] (!%p1595_p13)   ;;  %v732_v26 = vld [vmem:[%s2152_s30 + $0x58] sm:$0xff] (!%p1595_p13)  ;;  %v734_v30 = vld [vmem:[%s2152_s30 + $0x68] sm:$0xff] (!%p1595_p13) }
 0x12f   : > { %v669_v39 = vadd.f32 %v606_v35, %v480_v27  ;;  %v677_v40 = vadd.f32 %v638_v36, %v488_v28  ;;  %v1770_v41 = vpop.f32.mrb[2].mxu0  ;;  %v1778_v42 = vpop.f32.mrb[2].mxu1  ;;  %v731_v27 = vld [vmem:[%s2152_s30 + $0x50] sm:$0xff] (!%p1595_p13)  ;;  %v1953_v28 = vld [vmem:[%s2340_s4 + $0x18] sm:$0xff] (!%p1595_p13)   ;;  %1819 = vmatprep.subr.bf16.mxu0 (!%p1595_p13), %v1952_v25  ;;  %794 = vperm.xlu1 (!%p1595_p13), %1946, %v732_v26   ;;  %v1962_v36 = vld [vmem:[%s2147_s0] sm:$0xff] (!%p1595_p13)  }
 0x130   : > { %687 = vst [vmem:[#allocation2 + $0x10] sm:$0xff] %v671_v33  ;;  %695 = vst [vmem:[#allocation2 + $0x50] sm:$0xff] %v679_v34  ;;  %v672_v43 = vadd.f32 %v1770_v41, %v483_v31  ;;  %v680_v44 = vadd.f32 %v1778_v42, %v491_v32  ;;  %v609_v45 = vpop.f32.mrb[3].mxu0  ;;  %v641_v46 = vpop.f32.mrb[3].mxu1  ;;  %v1954_v29 = vld [vmem:[%s2339_s3 + $0x18] sm:$0xff] (!%p1595_p13)   ;;  %789 = vperm.xlu0 (!%p1595_p13), %1945, %v731_v27   ;;  %v733_v31 = vld [vmem:[%s2152_s30 + $0x60] sm:$0xff] (!%p1595_p13)  ;;  %1789 = vmatprep.subr.bf16.mxu1 (!%p1595_p13), %v1953_v28 }
 0x131   : > { %685 = vst [vmem:[#allocation2] sm:$0xff] %v669_v39  ;;  %693 = vst [vmem:[#allocation2 + $0x40] sm:$0xff] %v677_v40  ;;  %v670_v47 = vadd.f32 %v609_v45, %v481_v37  ;;  %v678_v48 = vadd.f32 %v641_v46, %v489_v38  ;;  %1820 = vmatpush3.bf16.msra.mxu0 (!%p1595_p13), %v1952_v25  ;;  %v1955_v32 = vld [vmem:[%s2340_s4 + $0x20] sm:$0xff] (!%p1595_p13)   ;;  %v736_v34 = vld [vmem:[%s2152_s30 + $0x78] sm:$0xff] (!%p1595_p13)  ;;  %1790 = vmatpush3.bf16.msra.mxu1 (!%p1595_p13), %v1953_v28 }
 0x132   : > { %688 = vst [vmem:[#allocation2 + $0x18] sm:$0xff] %v672_v43  ;;  %696 = vst [vmem:[#allocation2 + $0x58] sm:$0xff] %v680_v44  ;;  %1821 = vmatprep.subr.bf16.mxu0 (!%p1595_p13), %v1954_v29  ;;  %v1956_v33 = vld [vmem:[%s2339_s3 + $0x20] sm:$0xff] (!%p1595_p13)   ;;  %v735_v35 = vld [vmem:[%s2152_s30 + $0x70] sm:$0xff] (!%p1595_p13)  ;;  %1791 = vmatprep.subr.bf16.mxu1 (!%p1595_p13), %v1955_v32 }
 0x133   : > { %686 = vst [vmem:[#allocation2 + $0x8] sm:$0xff] %v670_v47  ;;  %694 = vst [vmem:[#allocation2 + $0x48] sm:$0xff] %v678_v48  ;;  %804 = vperm.xlu1 (!%p1595_p13), %1946, %v734_v30   ;;  %v1957_v37 = vld [vmem:[%s2340_s4 + $0x28] sm:$0xff] (!%p1595_p13)   ;;  %1799 = vmatprep.mubr.bf16.mxu1 (!%p1595_p13), %v1962_v36  ;;  %v1250_v40 = vld [vmem:[%s2157_s12] sm:$0xff] (!%p1595_p13) }
 0x134   : > { %799 = vperm.xlu0 (!%p1595_p13), %1945, %v733_v31   ;;  %v1958_v38 = vld [vmem:[%s2339_s3 + $0x28] sm:$0xff] (!%p1595_p13)   ;;  %v1959_v41 = vld [vmem:[%s2340_s4 + $0x30] sm:$0xff] (!%p1595_p13)   ;;  %v1253_v43 = vld [vmem:[%s2157_s12 + $0x18] sm:$0xff] (!%p1595_p13) }
 0x135   : > { %v1773_v53 = vpop.f32.mrb[4].mxu0  ;;  %v1781_v54 = vpop.f32.mrb[4].mxu1  ;;  %704 = sbr.rel (%p1595_p13) target bundleno = 668 (0x29c), region = 98  ;;  %1822 = vmatpush3.bf16.msra.mxu0 (!%p1595_p13), %v1954_v29  ;;  %v1251_v39 = vld [vmem:[%s2157_s12 + $0x8] sm:$0xff] (!%p1595_p13)  ;;  %1792 = vmatpush3.bf16.msra.mxu1 (!%p1595_p13), %v1955_v32  ;;  %v1960_v42 = vld [vmem:[%s2339_s3 + $0x30] sm:$0xff] (!%p1595_p13)   ;;  %v1961_v45 = vld [vmem:[%s2340_s4 + $0x38] sm:$0xff] (!%p1595_p13)  }
 0x136   : > { %v675_v57 = vadd.f32 %v1773_v53, %v486_v49  ;;  %v683_v58 = vadd.f32 %v1781_v54, %v494_v50  ;;  %v622_v59 = vpop.f32.mrb[5].mxu0  ;;  %v654_v60 = vpop.f32.mrb[5].mxu1  ;;  %1823 = vmatprep.subr.bf16.mxu0 (!%p1595_p13), %v1956_v33  ;;  %1793 = vmatprep.subr.bf16.mxu1 (!%p1595_p13), %v1957_v37  ;;  %v1252_v44 = vld [vmem:[%s2157_s12 + $0x10] sm:$0xff] (!%p1595_p13)  ;;  %v1963_v46 = vld [vmem:[%s2339_s3 + $0x38] sm:$0xff] (!%p1595_p13)   ;;  %v1255_v47 = vld [vmem:[%s2157_s12 + $0x28] sm:$0xff] (!%p1595_p13) }
 0x137   : > { %v673_v63 = vadd.f32 %v622_v59, %v484_v51  ;;  %v681_v0 = vadd.f32 %v654_v60, %v492_v52  ;;  %v1774_v1 = vpop.f32.mrb[6].mxu0  ;;  %v1782_v2 = vpop.f32.mrb[6].mxu1  ;;  %814 = vperm.xlu1 (!%p1595_p13), %1946, %v736_v34   ;;  %v1254_v48 = vld [vmem:[%s2157_s12 + $0x20] sm:$0xff] (!%p1595_p13)  ;;  %v1257_v49 = vld [vmem:[%s2157_s12 + $0x38] sm:$0xff] (!%p1595_p13)  ;;  %v1256_v50 = vld [vmem:[%s2157_s12 + $0x30] sm:$0xff] (!%p1595_p13) }
 0x138   : > { %691 = vst [vmem:[#allocation2 + $0x30] sm:$0xff] %v675_v57  ;;  %699 = vst [vmem:[#allocation2 + $0x70] sm:$0xff] %v683_v58  ;;  %v676_v3 = vadd.f32 %v1774_v1, %v487_v55  ;;  %v684_v4 = vadd.f32 %v1782_v2, %v495_v56  ;;  %v625_v5 = vpop.f32.mrb[7].mxu0  ;;  %v657_v6 = vpop.f32.mrb[7].mxu1  ;;  %809 = vperm.xlu0 (!%p1595_p13), %1945, %v735_v35   ;;  %v1964_v51 = vld [vmem:[%s2147_s0 + $0x8] sm:$0xff] (!%p1595_p13)   ;;  %v1965_v52 = vld [vmem:[%s2147_s0 + $0x10] sm:$0xff] (!%p1595_p13)  }
 0x139   : > { %689 = vst [vmem:[#allocation2 + $0x20] sm:$0xff] %v673_v63  ;;  %697 = vst [vmem:[#allocation2 + $0x60] sm:$0xff] %v681_v0  ;;  %v674_v7 = vadd.f32 %v625_v5, %v485_v61  ;;  %v682_v8 = vadd.f32 %v657_v6, %v493_v62  ;;  %1824 = vmatpush3.bf16.msra.mxu0 (!%p1595_p13), %v1956_v33  ;;  %1794 = vmatpush3.bf16.msra.mxu1 (!%p1595_p13), %v1957_v37  ;;  %v1259_v53 = vld [vmem:[%s2157_s12 + $0x48] sm:$0xff] (!%p1595_p13)  ;;  %v1258_v54 = vld [vmem:[%s2157_s12 + $0x40] sm:$0xff] (!%p1595_p13)  ;;  %v750_v2 = vpop.permute.xlu1 (!%p1595_p13), %749 }
 0x13a   : > { %692 = vst [vmem:[#allocation2 + $0x38] sm:$0xff] %v676_v3  ;;  %700 = vst [vmem:[#allocation2 + $0x78] sm:$0xff] %v684_v4  ;;  %1825 = vmatprep.subr.bf16.mxu0 (!%p1595_p13), %v1958_v38  ;;  %1795 = vmatprep.subr.bf16.mxu1 (!%p1595_p13), %v1959_v41  ;;  %v1261_v55 = vld [vmem:[%s2157_s12 + $0x58] sm:$0xff] (!%p1595_p13)  ;;  %v1260_v56 = vld [vmem:[%s2157_s12 + $0x50] sm:$0xff] (!%p1595_p13)  ;;  %v740_v3 = vpop.permute.xlu0 (!%p1595_p13), %739 }
 0x13b   : > { %690 = vst [vmem:[#allocation2 + $0x28] sm:$0xff] %v674_v7  ;;  %698 = vst [vmem:[#allocation2 + $0x68] sm:$0xff] %v682_v8  ;;  %1273 = vperm.xlu1 (!%p1595_p13), %1946, %v1251_v39   ;;  %v1966_v57 = vld [vmem:[%s2147_s0 + $0x18] sm:$0xff] (!%p1595_p13)   ;;  %v1967_v58 = vld [vmem:[%s2147_s0 + $0x20] sm:$0xff] (!%p1595_p13)  }
 0x13c   : > { %1268 = vperm.xlu0 %1945, %v1250_v40   ;;  %v1263_v59 = vld [vmem:[%s2157_s12 + $0x68] sm:$0xff]  ;;  %v1262_v60 = vld [vmem:[%s2157_s12 + $0x60] sm:$0xff]  ;;  %v1265_v61 = vld [vmem:[%s2157_s12 + $0x78] sm:$0xff] }
 0x13d   : > { %1826 = vmatpush3.bf16.msra.mxu0 %v1958_v38  ;;  %1796 = vmatpush3.bf16.msra.mxu1 %v1959_v41  ;;  %v1264_v62 = vld [vmem:[%s2157_s12 + $0x70] sm:$0xff]  ;;  %v1968_v63 = vld [vmem:[%s2147_s0 + $0x28] sm:$0xff]   ;;  %v1970_v1 = vld [vmem:[%s2147_s0 + $0x38] sm:$0xff]   ;;  %v755_v8 = vpop.permute.xlu1 %754 }
 0x13e   : > { %1827 = vmatprep.subr.bf16.mxu0 %v1960_v42  ;;  %1797 = vmatprep.subr.bf16.mxu1 %v1961_v45  ;;  %v1969_v0 = vld [vmem:[%s2147_s0 + $0x30] sm:$0xff]   ;;  %v705_v5 = vld [vmem:[#allocation2] sm:$0xff]  ;;  %v708_v6 = vld [vmem:[#allocation2 + $0x18] sm:$0xff]  ;;  %v745_v9 = vpop.permute.xlu0 %744 }
 0x13f   : > { %1283 = vperm.xlu1 %1946, %v1253_v43   ;;  %v707_v4 = vld [vmem:[#allocation2 + $0x10] sm:$0xff]  ;;  %v706_v7 = vld [vmem:[#allocation2 + $0x8] sm:$0xff]  ;;  %v817_v11 = vmul.f32 %v740_v3, %v705_v5  ;;  %v820_v12 = vmul.f32 %v755_v8, %v708_v6  ;;  %v713_v30 = vld [vmem:[#allocation2 + $0x40] sm:$0xff] }
 0x140   : > { %1278 = vperm.xlu0 %1945, %v1252_v44   ;;  %v819_v10 = vmul.f32 %v750_v2, %v707_v4  ;;  %v818_v13 = vmul.f32 %v745_v9, %v706_v7  ;;  %v709_v15 = vld [vmem:[#allocation2 + $0x20] sm:$0xff]  ;;  %v711_v23 = vld [vmem:[#allocation2 + $0x30] sm:$0xff]  ;;  %v714_v29 = vld [vmem:[#allocation2 + $0x48] sm:$0xff] }
 0x141   : > { %1828 = vmatpush3.bf16.msra.mxu0 %v1960_v42  ;;  %1798 = vmatpush3.bf16.msra.mxu1 %v1961_v45  ;;  %v765_v18 = vpop.permute.xlu1 %764  ;;  %v712_v22 = vld [vmem:[#allocation2 + $0x38] sm:$0xff]  ;;  %v715_v37 = vld [vmem:[#allocation2 + $0x50] sm:$0xff]  ;;  %v717_v44 = vld [vmem:[#allocation2 + $0x60] sm:$0xff] }
 0x142   : > { %1829 = vmatprep.subr.bf16.mxu0 %v1963_v46  ;;  %v710_v14 = vld [vmem:[#allocation2 + $0x28] sm:$0xff]  ;;  %v834_v16 = vpack.c.bf16 %v820_v12, %v819_v10  ;;  %v833_v17 = vpack.c.bf16 %v818_v13, %v817_v11  ;;  %v760_v19 = vpop.permute.xlu0 %759  ;;  %v716_v36 = vld [vmem:[#allocation2 + $0x58] sm:$0xff] }
 0x143   : > { %1293 = vperm.xlu1 %1946, %v1255_v47   ;;  %v822_v20 = vmul.f32 %v765_v18, %v710_v14  ;;  %v821_v21 = vmul.f32 %v760_v19, %v709_v15  ;;  %v718_v43 = vld [vmem:[#allocation2 + $0x68] sm:$0xff] }
 0x144   : > { %1288 = vperm.xlu0 %1945, %v1254_v48   ;;  %1800 = vmatmul.mubr.bf16.vlgmr.msra.gmra.mrb[0].mxu1 %v1964_v51  ;;  %v719_v51 = vld [vmem:[#allocation2 + $0x70] sm:$0xff] }
 0x145   : > { %1830 = vmatpush3.bf16.msra.mxu0 %v1963_v46  ;;  %1803 = vmatprep.mubr.bf16.mxu1 %v1965_v52  ;;  %v835_v24 = vpack.c.bf16 %v822_v20, %v821_v21  ;;  %v775_v25 = vpop.permute.xlu1 %774 }
 0x146   : > { %1831 = vmatprep.mubr.bf16.mxu0 %v833_v17  ;;  %v770_v26 = vpop.permute.xlu0 %769  ;;  %v824_v27 = vmul.f32 %v775_v25, %v712_v22  ;;  %v2283_v17 = vld [vmem:[%s2341_s5] ss:$0 sm:$0xff] }
 0x147   : > { %1303 = vperm.xlu1 %1946, %v1257_v49   ;;  %v823_v28 = vmul.f32 %v770_v26, %v711_v23 }
 0x148   : > { %1298 = vperm.xlu0 %1945, %v1256_v50   ;;  %1832 = vmatmul.mubr.bf16.vlgmr.msra.gmra.mrb[0].mxu0 %v834_v16  ;;  %v720_v50 = vld [vmem:[#allocation2 + $0x78] sm:$0xff] }
 0x149   : > { %1835 = vmatprep.mubr.bf16.mxu0 %v835_v24  ;;  %v836_v31 = vpack.c.bf16 %v824_v27, %v823_v28  ;;  %v785_v32 = vpop.permute.xlu1 %784 }
 0x14a   : > { %v780_v33 = vpop.permute.xlu0 %779  ;;  %v826_v34 = vmul.f32 %v785_v32, %v714_v29 }
 0x14b   : > { %1313 = vperm.xlu1 %1946, %v1259_v53   ;;  %v825_v35 = vmul.f32 %v780_v33, %v713_v30 }
 0x14c   : > { %1308 = vperm.xlu0 %1945, %v1258_v54   ;;  %1804 = vmatmul.mubr.bf16.gmra.mrb[4].mxu1 %v1966_v57 }
 0x14d   : > { %1807 = vmatprep.mubr.bf16.mxu1 %v1967_v58  ;;  %v837_v38 = vpack.c.bf16 %v826_v34, %v825_v35 }
 0x14f   : > { %1323 = vperm.xlu1 %1946, %v1261_v55  }
 0x150   : > { %1318 = vperm.xlu0 %1945, %v1260_v56   ;;  %1836 = vmatmul.mubr.bf16.gmra.mrb[4].mxu0 %v836_v31 }
 0x151   : > { %1839 = vmatprep.mubr.bf16.mxu0 %v837_v38 }
 0x153   : > { %1333 = vperm.xlu1 %1946, %v1263_v59  }
 0x154   : > { %1328 = vperm.xlu0 %1945, %v1262_v60   ;;  %1808 = vmatmul.mubr.bf16.gmra.mrb[8].mxu1 %v1968_v63 }
 0x155   : > { %1811 = vmatprep.mubr.bf16.mxu1 %v1969_v0 }
 0x157   : > { %1343 = vperm.xlu1 %1946, %v1265_v61  }
 0x158   : > { %1338 = vperm.xlu0 %1945, %v1264_v62  }
 0x15c   : > { %1812 = vmatmul.mubr.bf16.gmra.mrb[12].mxu1 %v1970_v1 }
 0x1ae   : > { %v795_v39 = vpop.permute.xlu1 %794 }
 0x1af   : > { %v790_v40 = vpop.permute.xlu0 %789  ;;  %v828_v41 = vmul.f32 %v795_v39, %v716_v36 }
 0x1b0   : > { %v827_v42 = vmul.f32 %v790_v40, %v715_v37 }
 0x1b2   : > { %v838_v45 = vpack.c.bf16 %v828_v41, %v827_v42  ;;  %v805_v46 = vpop.permute.xlu1 %804 }
 0x1b3   : > { %v800_v47 = vpop.permute.xlu0 %799  ;;  %v830_v48 = vmul.f32 %v805_v46, %v718_v43 }
 0x1b4   : > { %v829_v49 = vmul.f32 %v800_v47, %v717_v44  ;;  %1840 = vmatmul.mubr.bf16.gmra.mrb[8].mxu0 %v838_v45 }
 0x1b6   : > { %v839_v52 = vpack.c.bf16 %v830_v48, %v829_v49  ;;  %v815_v53 = vpop.permute.xlu1 %814 }
 0x1b7   : > { %v810_v54 = vpop.permute.xlu0 %809  ;;  %v832_v55 = vmul.f32 %v815_v53, %v720_v50 }
 0x1b8   : > { %v831_v56 = vmul.f32 %v810_v54, %v719_v51  ;;  %1843 = vmatprep.mubr.bf16.mxu0 %v839_v52 }
 0x1ba   : > { %v840_v57 = vpack.c.bf16 %v832_v55, %v831_v56  ;;  %v1274_v10 = vpop.permute.xlu1 %1273 }
 0x1bb   : > { %v1269_v11 = vpop.permute.xlu0 %1268 }
 0x1bc   : > { %1844 = vmatmul.mubr.bf16.gmra.mrb[12].mxu0 %v840_v57 }
 0x1be   : > { %v1284_v12 = vpop.permute.xlu1 %1283 }
 0x1bf   : > { %v1279_v13 = vpop.permute.xlu0 %1278 }
 0x1c2   : > { %v1294_v14 = vpop.permute.xlu1 %1293 }
 0x1c3   : > { %v1289_v15 = vpop.permute.xlu0 %1288 }
 0x1c6   : > { %v1304_v27 = vpop.permute.xlu1 %1303 }
 0x1c7   : > { %v1299_v29 = vpop.permute.xlu0 %1298 }
 0x1ca   : > { %v1314_v42 = vpop.permute.xlu1 %1313 }
 0x1cb   : > { %v1309_v46 = vpop.permute.xlu0 %1308 }
 0x1ce   : > { %v1324_v56 = vpop.permute.xlu1 %1323 }
 0x217   : > { %v1801_v58 = vpop.f32.mrb[0].mxu1 }
 0x218   : > { %v1019_v59 = vpop.f32.mrb[1].mxu1 }
 0x219   : > { %v1802_v60 = vpop.f32.mrb[2].mxu1 }
 0x21a   : > { %v1022_v61 = vpop.f32.mrb[3].mxu1 }
 0x21b   : > { %v1833_v16 = vpop.f32.mrb[0].mxu0 }
 0x21c   : > { %v1173_v18 = vadd.f32 %v1833_v16, %v1801_v58  ;;  %v1164_v19 = vpop.f32.mrb[1].mxu0 }
 0x21d   : > { %v1165_v20 = vadd.f32 %v1164_v19, %v1019_v59  ;;  %v1834_v21 = vpop.f32.mrb[2].mxu0 }
 0x21e   : > { %v1236_v22 = vadd.f32 %v2283_v17, %v1173_v18  ;;  %v1176_v23 = vadd.f32 %v1834_v21, %v1802_v60  ;;  %v1167_v24 = vpop.f32.mrb[3].mxu0  ;;  %v1319_v60 = vpop.permute.xlu0 %1318 }
 0x21f   : > { %v1805_v62 = vpop.f32.mrb[4].mxu1  ;;  %v1234_v25 = vadd.f32 %v2283_v17, %v1165_v20  ;;  %v1168_v26 = vadd.f32 %v1167_v24, %v1022_v61 }
 0x220   : > { %v1035_v63 = vpop.f32.mrb[5].mxu1  ;;  %v1237_v28 = vadd.f32 %v2283_v17, %v1176_v23  ;;  %v1348_v31 = vmul.f32 %v1279_v13, %v1236_v22 }
 0x221   : > { %v1806_v0 = vpop.f32.mrb[6].mxu1  ;;  %v1235_v30 = vadd.f32 %v2283_v17, %v1168_v26  ;;  %v1346_v33 = vmul.f32 %v1269_v11, %v1234_v25 }
 0x222   : > { %v1038_v1 = vpop.f32.mrb[7].mxu1  ;;  %v1349_v32 = vmul.f32 %v1284_v12, %v1237_v28  ;;  %v1329_v16 = vpop.permute.xlu0 %1328 }
 0x223   : > { %v1347_v34 = vmul.f32 %v1274_v10, %v1235_v30  ;;  %v1837_v35 = vpop.f32.mrb[4].mxu0 }
 0x224   : > { %v1664_v36 = vpack.c.bf16 %v1349_v32, %v1348_v31  ;;  %v1189_v37 = vadd.f32 %v1837_v35, %v1805_v62  ;;  %v1180_v38 = vpop.f32.mrb[5].mxu0 }
 0x225   : > { %v1659_v39 = vpack.c.bf16 %v1347_v34, %v1346_v33  ;;  %v1181_v40 = vadd.f32 %v1180_v38, %v1035_v63  ;;  %v1838_v41 = vpop.f32.mrb[6].mxu0 }
 0x226   : > { %1696 = vst [vmem:[%s2162_s22 + $0x8] sm:$0xff] %v1664_v36   ;;  %v1240_v43 = vadd.f32 %v2283_v17, %v1189_v37  ;;  %v1192_v44 = vadd.f32 %v1838_v41, %v1806_v0  ;;  %v1183_v45 = vpop.f32.mrb[7].mxu0  ;;  %v1339_v31 = vpop.permute.xlu0 %1338 }
 0x227   : > { %v1809_v2 = vpop.f32.mrb[8].mxu1  ;;  %1660 = vst [vmem:[%s2162_s22] sm:$0xff] %v1659_v39   ;;  %v1238_v47 = vadd.f32 %v2283_v17, %v1181_v40  ;;  %v1184_v48 = vadd.f32 %v1183_v45, %v1038_v1 }
 0x228   : > { %v1051_v3 = vpop.f32.mrb[9].mxu1  ;;  %v1241_v49 = vadd.f32 %v2283_v17, %v1192_v44  ;;  %v1352_v51 = vmul.f32 %v1299_v29, %v1240_v43 }
 0x229   : > { %v2268_v4 = vpop.f32.mrb[10].mxu1  ;;  %v1239_v50 = vadd.f32 %v2283_v17, %v1184_v48  ;;  %v1350_v53 = vmul.f32 %v1289_v15, %v1238_v47 }
 0x22a   : > { %v2270_v5 = vpop.f32.mrb[11].mxu1  ;;  %v1353_v52 = vmul.f32 %v1304_v27, %v1241_v49 }
 0x22b   : > { %v1351_v54 = vmul.f32 %v1294_v14, %v1239_v50  ;;  %v1334_v14 = vpop.permute.xlu1 %1333 }
 0x22c   : > { %v1674_v57 = vpack.c.bf16 %v1353_v52, %v1352_v51 }
 0x22d   : > { %v1669_v61 = vpack.c.bf16 %v1351_v54, %v1350_v53 }
 0x22e   : > { %1698 = vst [vmem:[%s2162_s22 + $0x18] sm:$0xff] %v1674_v57  }
 0x22f   : > { %v2272_v6 = vpop.f32.mrb[12].mxu1  ;;  %1697 = vst [vmem:[%s2162_s22 + $0x10] sm:$0xff] %v1669_v61   ;;  %v1344_v30 = vpop.permute.xlu1 %1343 }
 0x230   : > { %v2274_v7 = vpop.f32.mrb[13].mxu1 }
 0x231   : > { %v2276_v8 = vpop.f32.mrb[14].mxu1 }
 0x232   : > { %v2278_v9 = vpop.f32.mrb[15].mxu1 }
 0x287   : > { %v1841_v55 = vpop.f32.mrb[8].mxu0 }
 0x288   : > { %v1205_v58 = vadd.f32 %v1841_v55, %v1809_v2  ;;  %v1196_v59 = vpop.f32.mrb[9].mxu0 }
 0x289   : > { %v1197_v62 = vadd.f32 %v1196_v59, %v1051_v3  ;;  %v1842_v63 = vpop.f32.mrb[10].mxu0 }
 0x28a   : > { %v1244_v0 = vadd.f32 %v2283_v17, %v1205_v58  ;;  %v1208_v1 = vadd.f32 %v1842_v63, %v2268_v4  ;;  %v1199_v10 = vpop.f32.mrb[11].mxu0 }
 0x28b   : > { %v1242_v11 = vadd.f32 %v2283_v17, %v1197_v62  ;;  %v1200_v12 = vadd.f32 %v1199_v10, %v2270_v5 }
 0x28c   : > { %v1245_v13 = vadd.f32 %v2283_v17, %v1208_v1  ;;  %v1356_v15 = vmul.f32 %v1319_v60, %v1244_v0 }
 0x28d   : > { %v1243_v2 = vadd.f32 %v2283_v17, %v1200_v12  ;;  %v1354_v18 = vmul.f32 %v1309_v46, %v1242_v11 }
 0x28e   : > { %v1357_v3 = vmul.f32 %v1324_v56, %v1245_v13 }
 0x28f   : > { %v1355_v19 = vmul.f32 %v1314_v42, %v1243_v2  ;;  %v1845_v20 = vpop.f32.mrb[12].mxu0 }
 0x290   : > { %v1684_v4 = vpack.c.bf16 %v1357_v3, %v1356_v15  ;;  %v1221_v21 = vadd.f32 %v1845_v20, %v2272_v6  ;;  %v1212_v22 = vpop.f32.mrb[13].mxu0 }
 0x291   : > { %v1679_v23 = vpack.c.bf16 %v1355_v19, %v1354_v18  ;;  %v1213_v5 = vadd.f32 %v1212_v22, %v2274_v7  ;;  %v1846_v24 = vpop.f32.mrb[14].mxu0 }
 0x292   : > { %1700 = vst [vmem:[%s2162_s22 + $0x28] sm:$0xff] %v1684_v4   ;;  %v1248_v25 = vadd.f32 %v2283_v17, %v1221_v21  ;;  %v1224_v26 = vadd.f32 %v1846_v24, %v2276_v8  ;;  %v1215_v27 = vpop.f32.mrb[15].mxu0 }
 0x293   : > { %1699 = vst [vmem:[%s2162_s22 + $0x20] sm:$0xff] %v1679_v23   ;;  %v1246_v28 = vadd.f32 %v2283_v17, %v1213_v5  ;;  %v1216_v29 = vadd.f32 %v1215_v27, %v2278_v9 }
 0x294   : > { %v1249_v6 = vadd.f32 %v2283_v17, %v1224_v26  ;;  %v1360_v32 = vmul.f32 %v1339_v31, %v1248_v25 }
 0x295   : > { %v1247_v7 = vadd.f32 %v2283_v17, %v1216_v29  ;;  %v1358_v34 = vmul.f32 %v1329_v16, %v1246_v28 }
 0x296   : > { %v1361_v33 = vmul.f32 %v1344_v30, %v1249_v6 }
 0x297   : > { %v1359_v35 = vmul.f32 %v1334_v14, %v1247_v7 }
 0x298   : > { %v1694_v36 = vpack.c.bf16 %v1361_v33, %v1360_v32 }
 0x299   : > { %v1689_v37 = vpack.c.bf16 %v1359_v35, %v1358_v34 }
 0x29a   : > { %1702 = vst [vmem:[%s2162_s22 + $0x38] sm:$0xff] %v1694_v36  }
 0x29b   : > { %1701 = vst [vmem:[%s2162_s22 + $0x30] sm:$0xff] %v1689_v37  }
 0x29c PF: > { %s18_s11 = sadd.s32 1, %s2025_s11   ;;  %s2351_s23 = sld [smem:[#allocation4_spill]] }
 0x29d   : > { %p15_p0 = scmp.ge.s32.totalorder %s18_s11, 6   ;;  %s2352_s24 = sld [smem:[#allocation5_spill]] }
 0x29e   : > { %s2353_s27 = smov %s2005_s28  ;;  %s2354_s28 = smov %s2125_s18 }
 0x29f   : > { %s2355_s29 = smov %s2017_s9  ;;  %s2356_s30 = smov %s2021_s10 }
 0x2a0   :  { %17 = sbr.rel (!%p15_p0) target bundleno = 6 (0x6), region = 145 }
 0x2a2   : > { %s2357_s9 = smov %s2351_s23 }
 0x2a3   : > { %s2358_s10 = smov %s2352_s24 }

</bundles_post_ra>
